<compile_context>
chip_gen: v6e
topology: v6e:2x2x1
jax: 0.10.0
libtpu: 0.0.40
codegen_flags: <defaults>
</compile_context>

<pallas_src>
import math

import jax
import jax.numpy as jnp
from jax.experimental import pallas as pl
from jax.experimental.pallas import tpu as pltpu

# ---- config (small, consistent with the module) ----
B = 2            # batch
T = 8            # sequence length
D = 32           # emb_dim
N_HEADS = 4
HEAD_DIM = D // N_HEADS
HIDDEN = 4 * D   # FeedForward hidden dim
BT = B * T       # flattened (batch * seq) rows
EPS = 1e-5
DROP_RATE = 0.0  # TODO(synk): dropout is identity at rate 0 / eval; no RNG masking implemented


# ---------------- in-kernel helpers ----------------
def _layernorm(x, gamma, beta):
    # PyTorch LayerNorm: biased variance, eps inside sqrt
    mean = jnp.mean(x, axis=-1, keepdims=True)
    var = jnp.mean((x - mean) ** 2, axis=-1, keepdims=True)
    xhat = (x - mean) * jax.lax.rsqrt(var + EPS)
    return xhat * gamma + beta


def _gelu(x):
    # GPT-2 tanh-approx GELU
    c = math.sqrt(2.0 / math.pi)
    return 0.5 * x * (1.0 + jnp.tanh(c * (x + 0.044715 * x * x * x)))


# ---------------- Pallas kernel (single grid step, whole problem in VMEM) ----------------
def decoder_block_kernel(
    x_ref,        # (BT, D)
    wqkv_ref,     # (D, 3D)   fused Wq|Wk|Wv
    wo_ref,       # (D, D)
    w1_ref,       # (D, HIDDEN)
    w2_ref,       # (HIDDEN, D)
    small_ref,    # (8, 128)  packed tiny params (one row each)
    masks_ref,    # (N_HEADS*BT, D + BT)  [head mask | additive causal bias]
    out_ref,      # (BT, D)
):
    x = x_ref[...]                                           # (BT, D)

    # unpack the small-parameter tile (static row/lane slices)
    small = small_ref[...]
    ln1_g = small[0:1, 0:D]
    ln1_b = small[1:2, 0:D]
    b_qkv = small[2:3, 0:3 * D]
    bo    = small[3:4, 0:D]
    ln2_g = small[4:5, 0:D]
    ln2_b = small[5:6, 0:D]
    b1    = small[6:7, 0:HIDDEN]
    b2    = small[7:8, 0:D]

    masks = masks_ref[...]
    head_mask   = masks[:, 0:D]                              # (H*BT, D), exact 0/1
    causal_bias = masks[:, D:D + BT]                         # (H*BT, BT), 0 / -1e30

    # ---- x = ln_1(x) ----
    h = _layernorm(x, ln1_g, ln1_b)

    # ---- fused QKV projection: one MXU matmul with 96 output lanes ----
    qkv = jnp.dot(h, wqkv_ref[...], preferred_element_type=jnp.float32) + b_qkv
    scale = 1.0 / math.sqrt(HEAD_DIM)
    q = qkv[:, 0:D] * scale                                  # scale folded into q
    k = qkv[:, D:2 * D]
    v = qkv[:, 2 * D:3 * D]

    # ---- head separation via lane-mask + sublane stacking ----
    q_stk = jnp.concatenate([q] * N_HEADS, axis=0) * head_mask      # (H*BT, D)
    v_stk = jnp.concatenate([v] * N_HEADS, axis=0) * head_mask      # (H*BT, D)

    # scores for ALL heads in one full-width matmul:
    #   s[h*BT + i, j] = Q_h[i] . K_h[j]   ("NT" contraction, no explicit transpose)
    s = jax.lax.dot_general(q_stk, k, (((1,), (1,)), ((), ())),
                            preferred_element_type=jnp.float32)     # (H*BT, BT)

    # precomputed block-diagonal causal mask (batch separation + causality)
    s = s + causal_bias

    # softmax per (head, query) row; exact normalization (tolerance-safe)
    m = jnp.max(s, axis=-1, keepdims=True)
    p = jnp.exp(s - m)
    p = p / jnp.sum(p, axis=-1, keepdims=True)

    # per-head context accumulated straight into the (BT, D) layout
    # (masked V zeroes the other heads' lanes, so the sum is a head concat)
    ctx = jnp.dot(p[0:BT, :], v_stk[0:BT, :], preferred_element_type=jnp.float32)
    for hh in range(1, N_HEADS):                             # static, tiny head count
        sl = slice(hh * BT, (hh + 1) * BT)
        ctx = ctx + jnp.dot(p[sl, :], v_stk[sl, :], preferred_element_type=jnp.float32)

    attn_out = jnp.dot(ctx, wo_ref[...], preferred_element_type=jnp.float32) + bo

    # dropout(rate=0) => identity; residual add
    x = x + attn_out

    # ---- x = ln_2(x); x = ff(x); residual ----
    h2 = _layernorm(x, ln2_g, ln2_b)
    f = jnp.dot(h2, w1_ref[...], preferred_element_type=jnp.float32) + b1
    f = _gelu(f)
    f = jnp.dot(f, w2_ref[...], preferred_element_type=jnp.float32) + b2

    out_ref[...] = x + f


# ---------------- one-time parameter preparation (NOT on the call path) ----------------
def prepare_kernel_params(raw_params):
    (ln1_g, ln1_b, wq, bq, wk, bk, wv, bv, wo, bo,
     ln2_g, ln2_b, w1, b1, w2, b2) = raw_params

    # fuse QKV weights/biases once
    w_qkv = jnp.concatenate([wq, wk, wv], axis=1)            # (D, 3D)
    b_qkv = jnp.concatenate([bq, bk, bv], axis=1)            # (1, 3D)

    # pack the eight tiny params into one (8,128) f32 tile (one DMA in-kernel)
    small = jnp.zeros((8, 128), jnp.float32)
    small = small.at[0, :D].set(ln1_g[0])
    small = small.at[1, :D].set(ln1_b[0])
    small = small.at[2, :3 * D].set(b_qkv[0])
    small = small.at[3, :D].set(bo[0])
    small = small.at[4, :D].set(ln2_g[0])
    small = small.at[5, :D].set(ln2_b[0])
    small = small.at[6, :HIDDEN].set(b1[0])
    small = small.at[7, :D].set(b2[0])

    # precompute head-separation mask and additive block-diagonal causal bias
    head_of_lane = jnp.arange(D)[None, :] // HEAD_DIM                # (1, D)
    head_of_row = jnp.arange(N_HEADS * BT)[:, None] // BT            # (H*BT, 1)
    head_mask = (head_of_lane == head_of_row).astype(jnp.float32)    # (H*BT, D)

    i = jnp.arange(N_HEADS * BT)[:, None] % BT                       # flat query index
    j = jnp.arange(BT)[None, :]                                      # flat key index
    allowed = (i // T == j // T) & (i >= j)
    causal_bias = jnp.where(allowed, 0.0, -1e30).astype(jnp.float32)  # (H*BT, BT)

    masks = jnp.concatenate([head_mask, causal_bias], axis=1)        # (H*BT, D+BT)

    return (w_qkv, wo, w1, w2, small, masks)


# ---------------- wrapper (call path: reshape + one pallas_call only) ----------------
def decoder_block(x, kparams):
    w_qkv, wo, w1, w2, small, masks = kparams

    x_flat = x.reshape(BT, D)                                # free (row-major)

    def full(shape):
        return pl.BlockSpec(shape, lambda i, _s=shape: tuple(0 for _ in _s))

    in_specs = [
        full((BT, D)),                                       # x (all rows at once)
        full((D, 3 * D)),                                    # fused W_qkv
        full((D, D)),                                        # Wo
        full((D, HIDDEN)),                                   # W1
        full((HIDDEN, D)),                                   # W2
        full((8, 128)),                                      # packed small params
        full((N_HEADS * BT, D + BT)),                        # masks
    ]

    out = pl.pallas_call(
        decoder_block_kernel,
        out_shape=jax.ShapeDtypeStruct((BT, D), jnp.float32),
        grid_spec=pltpu.PrefetchScalarGridSpec(
            num_scalar_prefetch=0,
            grid=(1,),                                       # single step: everything DMA'd once
            in_specs=in_specs,
            out_specs=full((BT, D)),
        ),
        compiler_params=pltpu.CompilerParams(
            dimension_semantics=("arbitrary",)),
    )(x_flat, w_qkv, wo, w1, w2, small, masks)

    return out.reshape(B, T, D)


decoder_block = jax.jit(decoder_block)


# ---------------- pure-JAX reference (for sanity check) ----------------
def decoder_block_ref(x, params):
    (ln1_g, ln1_b, wq, bq, wk, bk, wv, bv, wo, bo,
     ln2_g, ln2_b, w1, b1, w2, b2) = params

    def ln(t, g, bta):
        mu = t.mean(-1, keepdims=True)
        var = ((t - mu) ** 2).mean(-1, keepdims=True)
        return (t - mu) / jnp.sqrt(var + EPS) * g + bta

    def gelu(t):
        c = math.sqrt(2.0 / math.pi)
        return 0.5 * t * (1.0 + jnp.tanh(c * (t + 0.044715 * t ** 3)))

    h = ln(x, ln1_g, ln1_b)
    q = h @ wq + bq
    k = h @ wk + bk
    v = h @ wv + bv
    q = q.reshape(B, T, N_HEADS, HEAD_DIM).transpose(0, 2, 1, 3)
    k = k.reshape(B, T, N_HEADS, HEAD_DIM).transpose(0, 2, 1, 3)
    v = v.reshape(B, T, N_HEADS, HEAD_DIM).transpose(0, 2, 1, 3)
    scores = jnp.einsum("bhqd,bhkd->bhqk", q, k) / math.sqrt(HEAD_DIM)
    mask = jnp.tril(jnp.ones((T, T), bool))
    scores = jnp.where(mask, scores, -1e30)
    p = jax.nn.softmax(scores, axis=-1)
    ctx = jnp.einsum("bhqk,bhkd->bhqd", p, v).transpose(0, 2, 1, 3).reshape(B, T, D)
    x = x + (ctx @ wo + bo)
    h2 = ln(x, ln2_g, ln2_b)
    f = gelu(h2 @ w1 + b1) @ w2 + b2
    return x + f


# ---------------- parameter init (deterministic) ----------------
def init_params(key):
    ks = jax.random.split(key, 12)
    s = 0.02
    ln1_g = jnp.ones((1, D), jnp.float32)
    ln1_b = jnp.zeros((1, D), jnp.float32)
    ln2_g = jnp.ones((1, D), jnp.float32)
    ln2_b = jnp.zeros((1, D), jnp.float32)
    wq = s * jax.random.normal(ks[0], (D, D), jnp.float32)
    wk = s * jax.random.normal(ks[1], (D, D), jnp.float32)
    wv = s * jax.random.normal(ks[2], (D, D), jnp.float32)
    wo = s * jax.random.normal(ks[3], (D, D), jnp.float32)
    bq = s * jax.random.normal(ks[4], (1, D), jnp.float32)
    bk = s * jax.random.normal(ks[5], (1, D), jnp.float32)
    bv = s * jax.random.normal(ks[6], (1, D), jnp.float32)
    bo = s * jax.random.normal(ks[7], (1, D), jnp.float32)
    w1 = s * jax.random.normal(ks[8], (D, HIDDEN), jnp.float32)
    b1 = s * jax.random.normal(ks[9], (1, HIDDEN), jnp.float32)
    w2 = s * jax.random.normal(ks[10], (HIDDEN, D), jnp.float32)
    b2 = s * jax.random.normal(ks[11], (1, D), jnp.float32)
    return (ln1_g, ln1_b, wq, bq, wk, bk, wv, bv, wo, bo,
            ln2_g, ln2_b, w1, b1, w2, b2)


if __name__ == "__main__":
    key = jax.random.PRNGKey(0)
    kx, kp = jax.random.split(key)
    x = jax.random.normal(kx, (B, T, D), jnp.float32)
    raw_params = init_params(kp)

    # one-time weight fusion / packing (NOT on the per-call path)
    kparams = jax.tree_util.tree_map(jax.block_until_ready,
                                     prepare_kernel_params(raw_params))

    out = decoder_block(x, kparams)
    out = jax.block_until_ready(out)

    ref = decoder_block_ref(x, raw_params)
    assert out.shape == (B, T, D)
    assert jnp.allclose(out, ref, atol=2e-4, rtol=1e-4), (
        f"max abs err = {jnp.max(jnp.abs(out - ref))}")

    print("KERNEL_OK")
</pallas_src>

<mosaic_0001>
module attributes {stable_mosaic.version = 11 : i64} {
  func.func @decoder_block_kernel(%arg0: i32, %arg1: memref<16x32xf32, #tpu.memory_space<vmem>>, %arg2: memref<32x96xf32, #tpu.memory_space<vmem>>, %arg3: memref<32x32xf32, #tpu.memory_space<vmem>>, %arg4: memref<32x128xf32, #tpu.memory_space<vmem>>, %arg5: memref<128x32xf32, #tpu.memory_space<vmem>>, %arg6: memref<8x128xf32, #tpu.memory_space<vmem>>, %arg7: memref<64x48xf32, #tpu.memory_space<vmem>>, %arg8: memref<16x32xf32, #tpu.memory_space<vmem>>) attributes {dimension_semantics = [#tpu.dimension_semantics<arbitrary>], iteration_bounds = array<i64: 1>, scalar_prefetch = 0 : i64, scratch_operands = 0 : i64, tpu.core_type = #tpu.core_type<tc>, window_params = [{pipeline_mode = #tpu.pipeline_mode<synchronous>, transform_indices = @transform_0, window_bounds = array<i64: 16, 32>}, {pipeline_mode = #tpu.pipeline_mode<synchronous>, transform_indices = @transform_1, window_bounds = array<i64: 32, 96>}, {pipeline_mode = #tpu.pipeline_mode<synchronous>, transform_indices = @transform_2, window_bounds = array<i64: 32, 32>}, {pipeline_mode = #tpu.pipeline_mode<synchronous>, transform_indices = @transform_3, window_bounds = array<i64: 32, 128>}, {pipeline_mode = #tpu.pipeline_mode<synchronous>, transform_indices = @transform_4, window_bounds = array<i64: 128, 32>}, {pipeline_mode = #tpu.pipeline_mode<synchronous>, transform_indices = @transform_5, window_bounds = array<i64: 8, 128>}, {pipeline_mode = #tpu.pipeline_mode<synchronous>, transform_indices = @transform_6, window_bounds = array<i64: 64, 48>}, {pipeline_mode = #tpu.pipeline_mode<synchronous>, transform_indices = @transform_7, window_bounds = array<i64: 16, 32>}]} {
    %c0 = arith.constant 0 : index
    %c0_0 = arith.constant 0 : index
    %0 = vector.load %arg1[%c0, %c0_0] : memref<16x32xf32, #tpu.memory_space<vmem>>, vector<16x32xf32>
    %c0_1 = arith.constant 0 : index
    %c0_2 = arith.constant 0 : index
    %1 = vector.load %arg6[%c0_1, %c0_2] : memref<8x128xf32, #tpu.memory_space<vmem>>, vector<8x128xf32>
    %2 = vector.extract_strided_slice %1 {offsets = [0, 0], sizes = [1, 32], strides = [1, 1]} : vector<8x128xf32> to vector<1x32xf32>
    %3 = vector.extract_strided_slice %1 {offsets = [1, 0], sizes = [1, 32], strides = [1, 1]} : vector<8x128xf32> to vector<1x32xf32>
    %4 = vector.extract_strided_slice %1 {offsets = [2, 0], sizes = [1, 96], strides = [1, 1]} : vector<8x128xf32> to vector<1x96xf32>
    %5 = vector.extract_strided_slice %1 {offsets = [3, 0], sizes = [1, 32], strides = [1, 1]} : vector<8x128xf32> to vector<1x32xf32>
    %6 = vector.extract_strided_slice %1 {offsets = [4, 0], sizes = [1, 32], strides = [1, 1]} : vector<8x128xf32> to vector<1x32xf32>
    %7 = vector.extract_strided_slice %1 {offsets = [5, 0], sizes = [1, 32], strides = [1, 1]} : vector<8x128xf32> to vector<1x32xf32>
    %8 = vector.extract_strided_slice %1 {offsets = [6, 0], sizes = [1, 128], strides = [1, 1]} : vector<8x128xf32> to vector<1x128xf32>
    %9 = vector.extract_strided_slice %1 {offsets = [7, 0], sizes = [1, 32], strides = [1, 1]} : vector<8x128xf32> to vector<1x32xf32>
    %c0_3 = arith.constant 0 : index
    %c0_4 = arith.constant 0 : index
    %10 = vector.load %arg7[%c0_3, %c0_4] : memref<64x48xf32, #tpu.memory_space<vmem>>, vector<64x48xf32>
    %11 = vector.extract_strided_slice %10 {offsets = [0, 0], sizes = [64, 32], strides = [1, 1]} : vector<64x48xf32> to vector<64x32xf32>
    %12 = vector.extract_strided_slice %10 {offsets = [0, 32], sizes = [64, 16], strides = [1, 1]} : vector<64x48xf32> to vector<64x16xf32>
    %cst = arith.constant dense<0.000000e+00> : vector<16xf32>
    %13 = vector.multi_reduction <add>, %0, %cst [1] : vector<16x32xf32> to vector<16xf32>
    %14 = vector.shape_cast %13 : vector<16xf32> to vector<16x1xf32>
    %cst_5 = arith.constant 3.200000e+01 : f32
    %15 = vector.broadcast %cst_5 : f32 to vector<16x1xf32>
    %16 = arith.divf %14, %15 : vector<16x1xf32>
    %17 = vector.broadcast %16 : vector<16x1xf32> to vector<16x32xf32>
    %18 = arith.subf %0, %17 : vector<16x32xf32>
    %19 = arith.mulf %18, %18 : vector<16x32xf32>
    %cst_6 = arith.constant dense<0.000000e+00> : vector<16xf32>
    %20 = vector.multi_reduction <add>, %19, %cst_6 [1] : vector<16x32xf32> to vector<16xf32>
    %21 = vector.shape_cast %20 : vector<16xf32> to vector<16x1xf32>
    %cst_7 = arith.constant 3.200000e+01 : f32
    %22 = vector.broadcast %cst_7 : f32 to vector<16x1xf32>
    %23 = arith.divf %21, %22 : vector<16x1xf32>
    %24 = vector.broadcast %16 : vector<16x1xf32> to vector<16x32xf32>
    %25 = arith.subf %0, %24 : vector<16x32xf32>
    %cst_8 = arith.constant 9.99999974E-6 : f32
    %26 = vector.broadcast %cst_8 : f32 to vector<16x1xf32>
    %27 = arith.addf %23, %26 : vector<16x1xf32>
    %28 = math.rsqrt %27 : vector<16x1xf32>
    %29 = vector.broadcast %28 : vector<16x1xf32> to vector<16x32xf32>
    %30 = arith.mulf %25, %29 : vector<16x32xf32>
    %31 = vector.broadcast %2 : vector<1x32xf32> to vector<16x32xf32>
    %32 = arith.mulf %30, %31 : vector<16x32xf32>
    %33 = vector.broadcast %3 : vector<1x32xf32> to vector<16x32xf32>
    %34 = arith.addf %32, %33 : vector<16x32xf32>
    %c0_9 = arith.constant 0 : index
    %c0_10 = arith.constant 0 : index
    %35 = vector.load %arg2[%c0_9, %c0_10] : memref<32x96xf32, #tpu.memory_space<vmem>>, vector<32x96xf32>
    %cst_11 = arith.constant dense<0.000000e+00> : vector<16x96xf32>
    %36 = tpu.matmul %34, %35, %cst_11 {dimension_numbers = #tpu.dot_dimension_numbers<[1], [0], [0], [1], [0, 0, 1, 1], [], []>} : vector<16x32xf32>, vector<32x96xf32>, vector<16x96xf32> -> vector<16x96xf32>
    %37 = vector.broadcast %4 : vector<1x96xf32> to vector<16x96xf32>
    %38 = arith.addf %36, %37 : vector<16x96xf32>
    %39 = vector.extract_strided_slice %38 {offsets = [0, 0], sizes = [16, 32], strides = [1, 1]} : vector<16x96xf32> to vector<16x32xf32>
    %cst_12 = arith.constant 0.353553385 : f32
    %40 = vector.broadcast %cst_12 : f32 to vector<16x32xf32>
    %41 = arith.mulf %39, %40 : vector<16x32xf32>
    %42 = vector.extract_strided_slice %38 {offsets = [0, 32], sizes = [16, 32], strides = [1, 1]} : vector<16x96xf32> to vector<16x32xf32>
    %43 = vector.extract_strided_slice %38 {offsets = [0, 64], sizes = [16, 32], strides = [1, 1]} : vector<16x96xf32> to vector<16x32xf32>
    %44 = tpu.concatenate %41, %41, %41, %41 in 0 : vector<16x32xf32>, vector<16x32xf32>, vector<16x32xf32>, vector<16x32xf32> -> vector<64x32xf32>
    %45 = arith.mulf %44, %11 : vector<64x32xf32>
    %46 = tpu.concatenate %43, %43, %43, %43 in 0 : vector<16x32xf32>, vector<16x32xf32>, vector<16x32xf32>, vector<16x32xf32> -> vector<64x32xf32>
    %47 = arith.mulf %46, %11 : vector<64x32xf32>
    %cst_13 = arith.constant dense<0.000000e+00> : vector<64x16xf32>
    %48 = tpu.matmul %45, %42, %cst_13 {dimension_numbers = #tpu.dot_dimension_numbers<[1], [1], [0], [0], [0, 0, 1, 0], [], []>} : vector<64x32xf32>, vector<16x32xf32>, vector<64x16xf32> -> vector<64x16xf32>
    %49 = arith.addf %48, %12 : vector<64x16xf32>
    %cst_14 = arith.constant dense<0xFF800000> : vector<64xf32>
    %50 = vector.multi_reduction <maximumf>, %49, %cst_14 [1] : vector<64x16xf32> to vector<64xf32>
    %51 = vector.shape_cast %50 : vector<64xf32> to vector<64x1xf32>
    %52 = vector.broadcast %51 : vector<64x1xf32> to vector<64x16xf32>
    %53 = arith.subf %49, %52 : vector<64x16xf32>
    %54 = math.exp %53 : vector<64x16xf32>
    %cst_15 = arith.constant dense<0.000000e+00> : vector<64xf32>
    %55 = vector.multi_reduction <add>, %54, %cst_15 [1] : vector<64x16xf32> to vector<64xf32>
    %56 = vector.shape_cast %55 : vector<64xf32> to vector<64x1xf32>
    %57 = vector.broadcast %56 : vector<64x1xf32> to vector<64x16xf32>
    %58 = arith.divf %54, %57 : vector<64x16xf32>
    %59 = vector.extract_strided_slice %58 {offsets = [0, 0], sizes = [16, 16], strides = [1, 1]} : vector<64x16xf32> to vector<16x16xf32>
    %60 = vector.extract_strided_slice %47 {offsets = [0, 0], sizes = [16, 32], strides = [1, 1]} : vector<64x32xf32> to vector<16x32xf32>
    %cst_16 = arith.constant dense<0.000000e+00> : vector<16x32xf32>
    %61 = tpu.matmul %59, %60, %cst_16 {dimension_numbers = #tpu.dot_dimension_numbers<[1], [0], [0], [1], [0, 0, 1, 1], [], []>} : vector<16x16xf32>, vector<16x32xf32>, vector<16x32xf32> -> vector<16x32xf32>
    %62 = vector.extract_strided_slice %58 {offsets = [16, 0], sizes = [16, 16], strides = [1, 1]} : vector<64x16xf32> to vector<16x16xf32>
    %63 = vector.extract_strided_slice %47 {offsets = [16, 0], sizes = [16, 32], strides = [1, 1]} : vector<64x32xf32> to vector<16x32xf32>
    %cst_17 = arith.constant dense<0.000000e+00> : vector<16x32xf32>
    %64 = tpu.matmul %62, %63, %cst_17 {dimension_numbers = #tpu.dot_dimension_numbers<[1], [0], [0], [1], [0, 0, 1, 1], [], []>} : vector<16x16xf32>, vector<16x32xf32>, vector<16x32xf32> -> vector<16x32xf32>
    %65 = arith.addf %61, %64 : vector<16x32xf32>
    %66 = vector.extract_strided_slice %58 {offsets = [32, 0], sizes = [16, 16], strides = [1, 1]} : vector<64x16xf32> to vector<16x16xf32>
    %67 = vector.extract_strided_slice %47 {offsets = [32, 0], sizes = [16, 32], strides = [1, 1]} : vector<64x32xf32> to vector<16x32xf32>
    %cst_18 = arith.constant dense<0.000000e+00> : vector<16x32xf32>
    %68 = tpu.matmul %66, %67, %cst_18 {dimension_numbers = #tpu.dot_dimension_numbers<[1], [0], [0], [1], [0, 0, 1, 1], [], []>} : vector<16x16xf32>, vector<16x32xf32>, vector<16x32xf32> -> vector<16x32xf32>
    %69 = arith.addf %65, %68 : vector<16x32xf32>
    %70 = vector.extract_strided_slice %58 {offsets = [48, 0], sizes = [16, 16], strides = [1, 1]} : vector<64x16xf32> to vector<16x16xf32>
    %71 = vector.extract_strided_slice %47 {offsets = [48, 0], sizes = [16, 32], strides = [1, 1]} : vector<64x32xf32> to vector<16x32xf32>
    %cst_19 = arith.constant dense<0.000000e+00> : vector<16x32xf32>
    %72 = tpu.matmul %70, %71, %cst_19 {dimension_numbers = #tpu.dot_dimension_numbers<[1], [0], [0], [1], [0, 0, 1, 1], [], []>} : vector<16x16xf32>, vector<16x32xf32>, vector<16x32xf32> -> vector<16x32xf32>
    %73 = arith.addf %69, %72 : vector<16x32xf32>
    %c0_20 = arith.constant 0 : index
    %c0_21 = arith.constant 0 : index
    %74 = vector.load %arg3[%c0_20, %c0_21] : memref<32x32xf32, #tpu.memory_space<vmem>>, vector<32x32xf32>
    %cst_22 = arith.constant dense<0.000000e+00> : vector<16x32xf32>
    %75 = tpu.matmul %73, %74, %cst_22 {dimension_numbers = #tpu.dot_dimension_numbers<[1], [0], [0], [1], [0, 0, 1, 1], [], []>} : vector<16x32xf32>, vector<32x32xf32>, vector<16x32xf32> -> vector<16x32xf32>
    %76 = vector.broadcast %5 : vector<1x32xf32> to vector<16x32xf32>
    %77 = arith.addf %75, %76 : vector<16x32xf32>
    %78 = arith.addf %0, %77 : vector<16x32xf32>
    %cst_23 = arith.constant dense<0.000000e+00> : vector<16xf32>
    %79 = vector.multi_reduction <add>, %78, %cst_23 [1] : vector<16x32xf32> to vector<16xf32>
    %80 = vector.shape_cast %79 : vector<16xf32> to vector<16x1xf32>
    %cst_24 = arith.constant 3.200000e+01 : f32
    %81 = vector.broadcast %cst_24 : f32 to vector<16x1xf32>
    %82 = arith.divf %80, %81 : vector<16x1xf32>
    %83 = vector.broadcast %82 : vector<16x1xf32> to vector<16x32xf32>
    %84 = arith.subf %78, %83 : vector<16x32xf32>
    %85 = arith.mulf %84, %84 : vector<16x32xf32>
    %cst_25 = arith.constant dense<0.000000e+00> : vector<16xf32>
    %86 = vector.multi_reduction <add>, %85, %cst_25 [1] : vector<16x32xf32> to vector<16xf32>
    %87 = vector.shape_cast %86 : vector<16xf32> to vector<16x1xf32>
    %cst_26 = arith.constant 3.200000e+01 : f32
    %88 = vector.broadcast %cst_26 : f32 to vector<16x1xf32>
    %89 = arith.divf %87, %88 : vector<16x1xf32>
    %90 = vector.broadcast %82 : vector<16x1xf32> to vector<16x32xf32>
    %91 = arith.subf %78, %90 : vector<16x32xf32>
    %cst_27 = arith.constant 9.99999974E-6 : f32
    %92 = vector.broadcast %cst_27 : f32 to vector<16x1xf32>
    %93 = arith.addf %89, %92 : vector<16x1xf32>
    %94 = math.rsqrt %93 : vector<16x1xf32>
    %95 = vector.broadcast %94 : vector<16x1xf32> to vector<16x32xf32>
    %96 = arith.mulf %91, %95 : vector<16x32xf32>
    %97 = vector.broadcast %6 : vector<1x32xf32> to vector<16x32xf32>
    %98 = arith.mulf %96, %97 : vector<16x32xf32>
    %99 = vector.broadcast %7 : vector<1x32xf32> to vector<16x32xf32>
    %100 = arith.addf %98, %99 : vector<16x32xf32>
    %c0_28 = arith.constant 0 : index
    %c0_29 = arith.constant 0 : index
    %101 = vector.load %arg4[%c0_28, %c0_29] : memref<32x128xf32, #tpu.memory_space<vmem>>, vector<32x128xf32>
    %cst_30 = arith.constant dense<0.000000e+00> : vector<16x128xf32>
    %102 = tpu.matmul %100, %101, %cst_30 {dimension_numbers = #tpu.dot_dimension_numbers<[1], [0], [0], [1], [0, 0, 1, 1], [], []>} : vector<16x32xf32>, vector<32x128xf32>, vector<16x128xf32> -> vector<16x128xf32>
    %103 = vector.broadcast %8 : vector<1x128xf32> to vector<16x128xf32>
    %104 = arith.addf %102, %103 : vector<16x128xf32>
    %cst_31 = arith.constant 5.000000e-01 : f32
    %105 = vector.broadcast %cst_31 : f32 to vector<16x128xf32>
    %106 = arith.mulf %105, %104 : vector<16x128xf32>
    %cst_32 = arith.constant 4.471500e-02 : f32
    %107 = vector.broadcast %cst_32 : f32 to vector<16x128xf32>
    %108 = arith.mulf %107, %104 : vector<16x128xf32>
    %109 = arith.mulf %108, %104 : vector<16x128xf32>
    %110 = arith.mulf %109, %104 : vector<16x128xf32>
    %111 = arith.addf %104, %110 : vector<16x128xf32>
    %cst_33 = arith.constant 0.797884583 : f32
    %112 = vector.broadcast %cst_33 : f32 to vector<16x128xf32>
    %113 = arith.mulf %112, %111 : vector<16x128xf32>
    %114 = math.tanh %113 : vector<16x128xf32>
    %cst_34 = arith.constant 1.000000e+00 : f32
    %115 = vector.broadcast %cst_34 : f32 to vector<16x128xf32>
    %116 = arith.addf %115, %114 : vector<16x128xf32>
    %117 = arith.mulf %106, %116 : vector<16x128xf32>
    %c0_35 = arith.constant 0 : index
    %c0_36 = arith.constant 0 : index
    %118 = vector.load %arg5[%c0_35, %c0_36] : memref<128x32xf32, #tpu.memory_space<vmem>>, vector<128x32xf32>
    %cst_37 = arith.constant dense<0.000000e+00> : vector<16x32xf32>
    %119 = tpu.matmul %117, %118, %cst_37 {dimension_numbers = #tpu.dot_dimension_numbers<[1], [0], [0], [1], [0, 0, 1, 1], [], []>} : vector<16x128xf32>, vector<128x32xf32>, vector<16x32xf32> -> vector<16x32xf32>
    %120 = vector.broadcast %9 : vector<1x32xf32> to vector<16x32xf32>
    %121 = arith.addf %119, %120 : vector<16x32xf32>
    %122 = arith.addf %78, %121 : vector<16x32xf32>
    %c0_38 = arith.constant 0 : index
    %c0_39 = arith.constant 0 : index
    %123 = vector.load %arg8[%c0_38, %c0_39] : memref<16x32xf32, #tpu.memory_space<vmem>>, vector<16x32xf32>
    tpu.vector_store %arg8[%c0_38, %c0_39], %122 {strides = array<i32>} : memref<16x32xf32, #tpu.memory_space<vmem>>, vector<16x32xf32>,
    return
  }
  func.func @transform_0(%arg0: i32) -> (i32, i32) {
    %c0_i32 = arith.constant 0 : i32
    %c0_i32_0 = arith.constant 0 : i32
    %c0_i32_1 = arith.constant 0 : i32
    return %c0_i32, %c0_i32_0 : i32, i32
  }
  func.func @transform_1(%arg0: i32) -> (i32, i32) {
    %c0_i32 = arith.constant 0 : i32
    %c0_i32_0 = arith.constant 0 : i32
    %c0_i32_1 = arith.constant 0 : i32
    return %c0_i32, %c0_i32_0 : i32, i32
  }
  func.func @transform_2(%arg0: i32) -> (i32, i32) {
    %c0_i32 = arith.constant 0 : i32
    %c0_i32_0 = arith.constant 0 : i32
    %c0_i32_1 = arith.constant 0 : i32
    return %c0_i32, %c0_i32_0 : i32, i32
  }
  func.func @transform_3(%arg0: i32) -> (i32, i32) {
    %c0_i32 = arith.constant 0 : i32
    %c0_i32_0 = arith.constant 0 : i32
    %c0_i32_1 = arith.constant 0 : i32
    return %c0_i32, %c0_i32_0 : i32, i32
  }
  func.func @transform_4(%arg0: i32) -> (i32, i32) {
    %c0_i32 = arith.constant 0 : i32
    %c0_i32_0 = arith.constant 0 : i32
    %c0_i32_1 = arith.constant 0 : i32
    return %c0_i32, %c0_i32_0 : i32, i32
  }
  func.func @transform_5(%arg0: i32) -> (i32, i32) {
    %c0_i32 = arith.constant 0 : i32
    %c0_i32_0 = arith.constant 0 : i32
    %c0_i32_1 = arith.constant 0 : i32
    return %c0_i32, %c0_i32_0 : i32, i32
  }
  func.func @transform_6(%arg0: i32) -> (i32, i32) {
    %c0_i32 = arith.constant 0 : i32
    %c0_i32_0 = arith.constant 0 : i32
    %c0_i32_1 = arith.constant 0 : i32
    return %c0_i32, %c0_i32_0 : i32, i32
  }
  func.func @transform_7(%arg0: i32) -> (i32, i32) {
    %c0_i32 = arith.constant 0 : i32
    %c0_i32_0 = arith.constant 0 : i32
    %c0_i32_1 = arith.constant 0 : i32
    return %c0_i32, %c0_i32_0 : i32, i32
  }
}

</mosaic_0001>

<bundles_post_ra>
// kernel: decoder_block.1
= control target key start
LH: loop header
LB: loop body
LE: loop exit
PB: predicated region body
PF: predicated region fallthrough
CT: control target
= control target key end

     0   :  { %vm38_vm0 = vcmask 261120   ;;  %s1818_s0 = inlined_call_operand.vmem [shape: f32[16,32], index: 0, kind: input, shape index: {}]   ;;  %s1819_s1 = inlined_call_operand.vmem [shape: f32[32,96], index: 1, kind: input, shape index: {}]   ;;  %s1820_s2 = inlined_call_operand.vmem [shape: f32[32,32], index: 2, kind: input, shape index: {}]   ;;  %s1821_s3 = inlined_call_operand.vmem [shape: f32[32,128], index: 3, kind: input, shape index: {}]   ;;  %s1822_s4 = inlined_call_operand.vmem [shape: f32[128,32], index: 4, kind: input, shape index: {}]   ;;  %s1823_s5 = inlined_call_operand.vmem [shape: f32[8,128], index: 5, kind: input, shape index: {}]   ;;  %s1824_s6 = inlined_call_operand.vmem [shape: f32[64,48], index: 6, kind: input, shape index: {}]   ;;  %s1825_s7 = inlined_call_operand.hbm [shape: f32[16,32], index: 7, kind: output, shape index: {}]  }
   0x1   :  { %v1497_v0 = vld [vmem:[%s1818_s0] sm:$0xff]  ;;  %v1502_v1 = vld [vmem:[%s1818_s0 + $0x8] sm:$0xff] }
   0x2   :  { %12 = vsyncpa [#allocation3], 0  ;;  %v39_v2 = vsel %vm38_vm0, %v1497_v0, 0.0  ;;  %v42_v3 = vsel %vm38_vm0, %v1502_v1, 0.0  ;;  %v81_v14 = vld [vmem:[%s1819_s1 + $0x18] sm:$0xff]  ;;  %v80_v15 = vld [vmem:[%s1819_s1 + $0x10] sm:$0xff]  ;;  %v66_v23 = vlaneseq }
   0x3   :  { %40 = vadd.xlane.f32.xlu0 %v39_v2  ;;  %1266 = vmatprep.subr.mxu0 %v81_v14  ;;  %v79_v16 = vld [vmem:[%s1819_s1 + $0x8] sm:$0xff]  ;;  %v78_v17 = vld [vmem:[%s1819_s1] sm:$0xff]  ;;  %s1449_s1 = smov 96   ;;  %v1556_v48 = vld [vmem:[%s1824_s6 + $0x10] sm:$0xff]  ;;  %vm380_vm1 = vcmask 130048  }
   0x4   :  { %1267 = vmatpush3.msra.mxu0 %v81_v14  ;;  %v1524_v25 = vshrl.u32 %v66_v23, 7  ;;  %v1530_v27 = vld [vmem:[%s1823_s5] sm:$0xff]  ;;  %v1569_v50 = vld [vmem:[%s1824_s6 + $0x18] sm:$0xff]  ;;  %v1575_v51 = vld [vmem:[%s1824_s6 + $0x30] sm:$0xff] }
   0x5   :  { %1268 = vmatprep.subr.mxu0 %v80_v15  ;;  %v1547_v45 = vld [vmem:[%s1824_s6] sm:$0xff]  ;;  %v1581_v52 = vld [vmem:[%s1824_s6 + $0x8] sm:$0xff]  ;;  %v1593_v54 = vld [vmem:[%s1824_s6 + $0x38] sm:$0xff] }
   0x6   :  { %1269 = vmatpush3.msra.mxu0 %v80_v15  ;;  %v68_v26 = vsub.s32 0, %v1524_v25  ;;  %v74_v28 = vsub.s32 1, %v1524_v25  ;;  %v84_v39 = vsub.s32 2, %v1524_v25  ;;  %v1563_v49 = vld [vmem:[%s1824_s6 + $0x20] sm:$0xff]  ;;  %v1587_v53 = vld [vmem:[%s1824_s6 + $0x28] sm:$0xff]  ;;  %s1450_s6 = smov 64  }
   0x7   :  { %43 = vadd.xlane.f32.xlu0 %v42_v3  ;;  %1270 = vmatprep.subr.mxu0 %v79_v16 }
   0x8   :  { %1271 = vmatpush3.msra.mxu0 %v79_v16  ;;  %v69_v29 = vrot.slane %v1530_v27, %v68_v26  ;;  %v75_v32 = vrot.slane %v1530_v27, %v74_v28  ;;  %v85_v40 = vrot.slane %v1530_v27, %v84_v39 }
   0x9   :  { %1272 = vmatprep.subr.mxu0 %v78_v17 }
   0xa   :  { %1273 = vmatpush3.msra.mxu0 %v78_v17 }
  0x8c   :  { %v41_v4 = vpop.xlane.xlu0 %40 }
  0x8d   :  { %v46_v5 = vmul.f32 0.03125, %v41_v4 }
  0x8f   :  { %v48_v6 = vsub.f32 %v1497_v0, %v46_v5 }
  0x90   :  { %v44_v7 = vpop.xlane.xlu0 %43 }
  0x91   :  { %v47_v8 = vmul.f32 0.03125, %v44_v7  ;;  %v50_v9 = vmul.f32 %v48_v6, %v48_v6 }
  0x93   :  { %v49_v10 = vsub.f32 %v1502_v1, %v47_v8  ;;  %v52_v11 = vsel %vm38_vm0, %v50_v9, 0.0 }
  0x94   :  { %53 = vadd.xlane.f32.xlu1 %v52_v11 }
  0x95   :  { %v51_v12 = vmul.f32 %v49_v10, %v49_v10 }
  0x97   :  { %v55_v13 = vsel %vm38_vm0, %v51_v12, 0.0 }
  0x98   :  { %56 = vadd.xlane.f32.xlu1 %v55_v13 }
 0x11d   :  { %v54_v18 = vpop.xlane.xlu1 %53 }
 0x11e   :  { %v58_v19 = vmul.f32 0.03125, %v54_v18 }
 0x120   :  { %v60_v20 = vadd.f32 1e-05, %v58_v19 }
 0x121   :  { %v57_v21 = vpop.xlane.xlu1 %56 }
 0x122   :  { %1383 = vrsqrt.f32 %v60_v20  ;;  %v59_v22 = vmul.f32 0.03125, %v57_v21 }
 0x124   :  { %v61_v24 = vadd.f32 1e-05, %v59_v22 }
 0x126   :  { %1385 = vrsqrt.f32 %v61_v24 }
 0x12f   :  { %v1384_v30 = vpop.eup %1383 }
 0x130   :  { %v64_v31 = vmul.f32 %v1384_v30, %v48_v6 }
 0x132   :  { %v70_v33 = vmul.f32 %v69_v29, %v64_v31 }
 0x133   :  { %v1386_v34 = vpop.eup %1385 }
 0x134   :  { %v65_v35 = vmul.f32 %v1386_v34, %v49_v10  ;;  %v76_v36 = vadd.f32 %v75_v32, %v70_v33 }
 0x136   :  { %v71_v37 = vmul.f32 %v69_v29, %v65_v35  ;;  %1274 = vmatprep.mubr.msk.f32.mxu0 %vm38_vm0, %v76_v36 }
 0x138   :  { %v77_v38 = vadd.f32 %v75_v32, %v71_v37 }
 0x13a   :  { %1275 = vmatmul.mubr.msk.f32.vlgmr.msra.gmra.mxu0 %vm38_vm0, %v77_v38 }
 0x1fa   :  { %v1276_v41 = vpop.f32.mrf.mxu0 }
 0x1fb   :  { %v1539_v42 = vadd.f32 %v1276_v41, %v85_v40 }
 0x1fc   :  { %v158_v43 = vpop.f32.mrf.mxu0 }
 0x1fd   :  { %v1541_v44 = vadd.f32 %v158_v43, %v85_v40  ;;  %221 = vrot.lane.b32.xlu0 %v1539_v42, %s1449_s1  ;;  %v168_v57 = vmul.f32 0.35355338, %v1539_v42 }
 0x1ff   :  { %219 = vrot.lane.b32.xlu1 %v1541_v44, %s1449_s1  ;;  %v167_v46 = vmul.f32 0.35355338, %v1541_v44  ;;  %v170_v58 = vmul.f32 %v168_v57, %v1581_v52  ;;  %v172_v60 = vmul.f32 %v168_v57, %v1569_v50  ;;  %v174_v62 = vmul.f32 %v168_v57, %v1587_v53 }
 0x200   :  { %v176_v2 = vmul.f32 %v168_v57, %v1593_v54 }
 0x201   :  { %v169_v47 = vmul.f32 %v167_v46, %v1547_v45  ;;  %223 = vrot.lane.b32.xlu0 %v1547_v45, %s1449_s1  ;;  %v171_v59 = vmul.f32 %v167_v46, %v1556_v48  ;;  %v173_v61 = vmul.f32 %v167_v46, %v1563_v49  ;;  %v175_v63 = vmul.f32 %v167_v46, %v1575_v51 }
 0x203   :  { %1281 = vmatprep.mubr.msk.f32.mxu1 %vm38_vm0, %v169_v47  ;;  %227 = vrot.lane.b32.xlu1 %v1556_v48, %s1449_s1 }
 0x205   :  { %231 = vrot.lane.b32.xlu0 %v1563_v49, %s1449_s1 }
 0x207   :  { %229 = vrot.lane.b32.xlu1 %v1569_v50, %s1449_s1 }
 0x209   :  { %235 = vrot.lane.b32.xlu0 %v1575_v51, %s1449_s1 }
 0x20b   :  { %225 = vrot.lane.b32.xlu1 %v1581_v52, %s1449_s1 }
 0x20f   :  { %233 = vrot.lane.b32.xlu1 %v1587_v53, %s1449_s1 }
 0x213   :  { %237 = vrot.lane.b32.xlu1 %v1593_v54, %s1449_s1 }
 0x26f   :  { %v222_v55 = vpop.permute.xlu0 %221 }
 0x270   :  { %1277 = vmatprep.subr.msk.mxu1 %vm38_vm0, %v222_v55 }
 0x271   :  { %1278 = vmatpush3.xpose.msk.msra.mxu1 %vm38_vm0, %v222_v55  ;;  %v220_v56 = vpop.permute.xlu1 %219 }
 0x272   :  { %1279 = vmatprep.subr.msk.mxu1 %vm38_vm0, %v220_v56 }
 0x273   :  { %v224_v7 = vpop.permute.xlu0 %223 }
 0x275   :  { %1280 = vmatpush3.xpose.msk.msra.mxu1 %vm38_vm0, %v220_v56  ;;  %v228_v3 = vpop.permute.xlu1 %227 }
 0x277   :  { %v232_v18 = vpop.permute.xlu0 %231 }
 0x278   :  { %1282 = vmatmul.mubr.msk.f32.vlgmr.msra.gmra.mxu1 %vm38_vm0, %v170_v58 }
 0x279   :  { %1284 = vmatprep.mubr.msk.f32.mxu1 %vm38_vm0, %v171_v59  ;;  %v230_v4 = vpop.permute.xlu1 %229 }
 0x27b   :  { %v236_v31 = vpop.permute.xlu0 %235 }
 0x27c   :  { %1285 = vmatmul.mubr.msk.f32.gmra.mxu1 %vm38_vm0, %v172_v60 }
 0x27d   :  { %1287 = vmatprep.mubr.msk.f32.mxu1 %vm38_vm0, %v173_v61  ;;  %v226_v5 = vpop.permute.xlu1 %225 }
 0x280   :  { %1288 = vmatmul.mubr.msk.f32.gmra.mxu1 %vm38_vm0, %v174_v62 }
 0x281   :  { %1290 = vmatprep.mubr.msk.f32.mxu1 %vm38_vm0, %v175_v63  ;;  %v234_v11 = vpop.permute.xlu1 %233 }
 0x284   :  { %1291 = vmatmul.mubr.msk.f32.gmra.mxu1 %vm38_vm0, %v176_v2 }
 0x285   :  { %v238_v23 = vpop.permute.xlu1 %237 }
 0x338   :  { %v1283_v6 = vpop.f32.mrf.mxu1 }
 0x339   :  { %v347_v19 = vadd.f32 %v1283_v6, %v226_v5 }
 0x33a   :  { %v341_v8 = vpop.f32.mrf.mxu1 }
 0x33b   :  { %v1615_v9 = vadd.f32 %v341_v8, %v224_v7  ;;  %v384_v30 = vsel %vm380_vm1, %v347_v19, -inf }
 0x33c   :  { %v1286_v10 = vpop.f32.mrf.mxu1 }
 0x33d   :  { %v1617_v12 = vadd.f32 %v1286_v10, %v230_v4  ;;  %v381_v13 = vsel %vm380_vm1, %v1615_v9, -inf }
 0x33e   :  { %v351_v14 = vpop.f32.mrf.mxu1  ;;  %382 = vmax.xlane.f32.xlu0 %v381_v13 }
 0x33f   :  { %v1621_v15 = vadd.f32 %v351_v14, %v228_v3  ;;  %v390_v16 = vsel %vm380_vm1, %v1617_v12, -inf }
 0x340   :  { %391 = vmax.xlane.f32.xlu1 %v390_v16  ;;  %v1289_v17 = vpop.f32.mrf.mxu1 }
 0x341   :  { %v1625_v20 = vadd.f32 %v1289_v17, %v234_v11  ;;  %v387_v21 = vsel %vm380_vm1, %v1621_v15, -inf }
 0x342   :  { %v361_v22 = vpop.f32.mrf.mxu1  ;;  %388 = vmax.xlane.f32.xlu0 %v387_v21 }
 0x343   :  { %v396_v24 = vsel %vm380_vm1, %v1625_v20, -inf  ;;  %v1631_v28 = vadd.f32 %v361_v22, %v232_v18 }
 0x344   :  { %397 = vmax.xlane.f32.xlu1 %v396_v24  ;;  %v1292_v26 = vpop.f32.mrf.mxu1 }
 0x345   :  { %v1633_v29 = vadd.f32 %v1292_v26, %v238_v23  ;;  %v393_v35 = vsel %vm380_vm1, %v1631_v28, -inf }
 0x346   :  { %v371_v32 = vpop.f32.mrf.mxu1  ;;  %385 = vmax.xlane.f32.xlu0 %v384_v30 }
 0x347   :  { %v402_v33 = vsel %vm380_vm1, %v1633_v29, -inf  ;;  %v372_v34 = vadd.f32 %v371_v32, %v236_v31 }
 0x348   :  { %403 = vmax.xlane.f32.xlu1 %v402_v33 }
 0x349   :  { %v399_v36 = vsel %vm380_vm1, %v372_v34, -inf }
 0x34a   :  { %394 = vmax.xlane.f32.xlu0 %v393_v35 }
 0x34e   :  { %400 = vmax.xlane.f32.xlu0 %v399_v36 }
 0x359   :  { %189 = vrot.lane.b32.xlu1 %v1556_v48, %s1450_s6 }
 0x35d   :  { %187 = vrot.lane.b32.xlu1 %v1581_v52, %s1450_s6 }
 0x361   :  { %185 = vrot.lane.b32.xlu1 %v1547_v45, %s1450_s6 }
 0x364   :  { %191 = vrot.lane.b32.xlu0 %v1569_v50, %s1450_s6 }
 0x365   :  { %193 = vrot.lane.b32.xlu1 %v1563_v49, %s1450_s6 }
 0x368   :  { %195 = vrot.lane.b32.xlu0 %v1587_v53, %s1450_s6 }
 0x369   :  { %197 = vrot.lane.b32.xlu1 %v1575_v51, %s1450_s6 }
 0x36c   :  { %199 = vrot.lane.b32.xlu0 %v1593_v54, %s1450_s6 }
 0x3c7   :  { %v383_v37 = vpop.xlane.xlu0 %382 }
 0x3c8   :  { %v405_v60 = vsub.f32 %v1615_v9, %v383_v37 }
 0x3c9   :  { %v392_v38 = vpop.xlane.xlu1 %391 }
 0x3ca   :  { %v408_v62 = vsub.f32 %v1617_v12, %v392_v38  ;;  %v413_v63 = vmul.f32 1.442695, %v405_v60 }
 0x3cb   :  { %v389_v39 = vpop.xlane.xlu0 %388 }
 0x3cc   :  { %v407_v2 = vsub.f32 %v1621_v15, %v389_v39  ;;  %v419_v3 = vmul.f32 1.442695, %v408_v62 }
 0x3cd   :  { %v398_v40 = vpop.xlane.xlu1 %397 }
 0x3ce   :  { %v410_v4 = vsub.f32 %v1625_v20, %v398_v40  ;;  %v417_v5 = vmul.f32 1.442695, %v407_v2 }
 0x3cf   :  { %v386_v41 = vpop.xlane.xlu0 %385 }
 0x3d0   :  { %v406_v59 = vsub.f32 %v347_v19, %v386_v41  ;;  %v423_v7 = vmul.f32 1.442695, %v410_v4 }
 0x3d1   :  { %v404_v43 = vpop.xlane.xlu1 %403 }
 0x3d2   :  { %v415_v61 = vmul.f32 1.442695, %v406_v59  ;;  %v412_v8 = vsub.f32 %v1633_v29, %v404_v43 }
 0x3d3   :  { %v395_v45 = vpop.xlane.xlu0 %394 }
 0x3d4   :  { %1387 = vpow2.f32 %v415_v61  ;;  %v409_v6 = vsub.f32 %v1631_v28, %v395_v45  ;;  %v427_v11 = vmul.f32 1.442695, %v412_v8  ;;  %v829_v8 = vld [vmem:[%s1820_s2] sm:$0xff] }
 0x3d5   :  { %v190_v46 = vpop.permute.xlu1 %189  ;;  %1389 = vpow2.f32 %v413_v63 }
 0x3d6   :  { %v211_v47 = vmul.f32 %v190_v46, %v1541_v44  ;;  %1391 = vpow2.f32 %v419_v3  ;;  %v421_v9 = vmul.f32 1.442695, %v409_v6  ;;  %v831_v6 = vld [vmem:[%s1820_s2 + $0x10] sm:$0xff] }
 0x3d7   :  { %v401_v48 = vpop.xlane.xlu0 %400  ;;  %1393 = vpow2.f32 %v417_v5  ;;  %v832_v5 = vld [vmem:[%s1820_s2 + $0x18] sm:$0xff] }
 0x3d8   :  { %471 = vrot.lane.b32.xlu1 %v211_v47, %s1450_s6  ;;  %v411_v10 = vsub.f32 %v372_v34, %v401_v48  ;;  %1395 = vpow2.f32 %v423_v7  ;;  %v830_v7 = vld [vmem:[%s1820_s2 + $0x8] sm:$0xff] }
 0x3d9   :  { %v188_v49 = vpop.permute.xlu1 %187  ;;  %1397 = vpow2.f32 %v421_v9 }
 0x3da   :  { %v210_v50 = vmul.f32 %v188_v49, %v1539_v42  ;;  %v425_v12 = vmul.f32 1.442695, %v411_v10  ;;  %1399 = vpow2.f32 %v427_v11 }
 0x3db   :  { %v192_v51 = vpop.permute.xlu0 %191 }
 0x3dc   :  { %v212_v52 = vmul.f32 %v192_v51, %v1539_v42  ;;  %562 = vrot.lane.b32.xlu1 %v210_v50, %s1450_s6  ;;  %1401 = vpow2.f32 %v425_v12 }
 0x3dd   :  { %v186_v53 = vpop.permute.xlu1 %185 }
 0x3de   :  { %v209_v54 = vmul.f32 %v186_v53, %v1541_v44  ;;  %473 = vrot.lane.b32.xlu0 %v212_v52, %s1450_s6 }
 0x3df   :  { %v196_v55 = vpop.permute.xlu0 %195 }
 0x3e0   :  { %v214_v56 = vmul.f32 %v196_v55, %v1539_v42  ;;  %560 = vrot.lane.b32.xlu1 %v209_v54, %s1450_s6 }
 0x3e1   :  { %v194_v57 = vpop.permute.xlu1 %193  ;;  %v1675_v13 = vpop.eup %1387 }
 0x3e2   :  { %v213_v58 = vmul.f32 %v194_v57, %v1541_v44  ;;  %651 = vrot.lane.b32.xlu0 %v214_v56, %s1450_s6  ;;  %v432_v14 = vsel %vm380_vm1, %v1675_v13, 0.0  ;;  %v1390_v15 = vpop.eup %1389 }
 0x3e3   :  { %v1392_v16 = vpop.eup %1391  ;;  %v429_v17 = vsel %vm380_vm1, %v1390_v15, 0.0  ;;  %v200_v33 = vpop.permute.xlu0 %199 }
 0x3e4   :  { %649 = vrot.lane.b32.xlu1 %v213_v58, %s1450_s6  ;;  %v1394_v18 = vpop.eup %1393  ;;  %v438_v19 = vsel %vm380_vm1, %v1392_v16, 0.0  ;;  %v216_v34 = vmul.f32 %v200_v33, %v1539_v42 }
 0x3e5   :  { %v1681_v20 = vpop.eup %1395  ;;  %v435_v21 = vsel %vm380_vm1, %v1394_v18, 0.0  ;;  %v198_v31 = vpop.permute.xlu1 %197 }
 0x3e6   :  { %v1398_v22 = vpop.eup %1397  ;;  %v444_v23 = vsel %vm380_vm1, %v1681_v20, 0.0  ;;  %v215_v32 = vmul.f32 %v198_v31, %v1541_v44 }
 0x3e7   :  { %v1686_v24 = vpop.eup %1399  ;;  %v441_v26 = vsel %vm380_vm1, %v1398_v22, 0.0 }
 0x3e8   :  { %v450_v29 = vsel %vm380_vm1, %v1686_v24, 0.0 }
 0x3e9   :  { %v1689_v28 = vpop.eup %1401 }
 0x3ea   :  { %v447_v30 = vsel %vm380_vm1, %v1689_v28, 0.0 }
 0x401   :  { %433 = vadd.xlane.f32.xlu0 %v432_v14 }
 0x405   :  { %430 = vadd.xlane.f32.xlu0 %v429_v17 }
 0x408   :  { %439 = vadd.xlane.f32.xlu1 %v438_v19 }
 0x409   :  { %436 = vadd.xlane.f32.xlu0 %v435_v21 }
 0x40c   :  { %445 = vadd.xlane.f32.xlu1 %v444_v23  ;;  %v835_v23 = vsub.s32 3, %v1524_v25 }
 0x40d   :  { %442 = vadd.xlane.f32.xlu0 %v441_v26 }
 0x410   :  { %451 = vadd.xlane.f32.xlu1 %v450_v29 }
 0x411   :  { %448 = vadd.xlane.f32.xlu0 %v447_v30 }
 0x421   :  { %740 = vrot.lane.b32.xlu1 %v215_v32, %s1450_s6 }
 0x427   :  { %742 = vrot.lane.b32.xlu0 %v216_v34, %s1450_s6 }
 0x44a   :  { %v472_v35 = vpop.permute.xlu1 %471 }
 0x44e   :  { %v563_v37 = vpop.permute.xlu1 %562 }
 0x450   :  { %v474_v36 = vpop.permute.xlu0 %473 }
 0x451   :  { %1293 = vmatprep.subr.mxu0 %v474_v36 }
 0x452   :  { %1294 = vmatpush3.msra.mxu0 %v474_v36  ;;  %v561_v39 = vpop.permute.xlu1 %560 }
 0x453   :  { %1295 = vmatprep.subr.mxu0 %v472_v35 }
 0x454   :  { %1296 = vmatpush3.msra.mxu0 %v472_v35  ;;  %v652_v38 = vpop.permute.xlu0 %651 }
 0x455   :  { %1300 = vmatprep.subr.mxu0 %v563_v37 }
 0x456   :  { %v650_v41 = vpop.permute.xlu1 %649 }
 0x48a   :  { %v434_v40 = vpop.xlane.xlu0 %433 }
 0x48e   :  { %v431_v44 = vpop.xlane.xlu0 %430 }
 0x48f   :  { %1403 = vrcp.f32 %v431_v44 }
 0x491   :  { %v440_v43 = vpop.xlane.xlu1 %439 }
 0x492   :  { %1405 = vrcp.f32 %v440_v43  ;;  %v437_v45 = vpop.xlane.xlu0 %436  ;;  %v961_v43 = vld [vmem:[%s1821_s3 + $0x18] sm:$0xff] }
 0x493   :  { %1407 = vrcp.f32 %v437_v45  ;;  %v960_v45 = vld [vmem:[%s1821_s3 + $0x10] sm:$0xff] }
 0x494   :  { %1409 = vrcp.f32 %v434_v40 }
 0x495   :  { %v446_v42 = vpop.xlane.xlu1 %445 }
 0x496   :  { %v443_v46 = vpop.xlane.xlu0 %442 }
 0x497   :  { %1411 = vrcp.f32 %v443_v46  ;;  %v958_v46 = vld [vmem:[%s1821_s3] sm:$0xff] }
 0x498   :  { %1413 = vrcp.f32 %v446_v42  ;;  %v959_v42 = vld [vmem:[%s1821_s3 + $0x8] sm:$0xff] }
 0x499   :  { %v452_v48 = vpop.xlane.xlu1 %451 }
 0x49a   :  { %v449_v47 = vpop.xlane.xlu0 %448 }
 0x49b   :  { %1415 = vrcp.f32 %v449_v47 }
 0x49c   :  { %v1404_v49 = vpop.eup %1403  ;;  %1417 = vrcp.f32 %v452_v48 }
 0x49d   :  { %v454_v55 = vmul.f32 %v1404_v49, %v1390_v15  ;;  %v741_v3 = vpop.permute.xlu1 %740 }
 0x49e   :  { %v743_v63 = vpop.permute.xlu0 %742 }
 0x49f   :  { %v1406_v50 = vpop.eup %1405 }
 0x4a0   :  { %v1408_v51 = vpop.eup %1407  ;;  %v460_v53 = vmul.f32 %v1406_v50, %v1392_v16 }
 0x4a1   :  { %v458_v52 = vmul.f32 %v1408_v51, %v1394_v18  ;;  %v1410_v54 = vpop.eup %1409 }
 0x4a2   :  { %v456_v57 = vmul.f32 %v1410_v54, %v1675_v13  ;;  %v954_v54 = vsub.s32 5, %v1524_v25 }
 0x4a3   :  { %1297 = vmatprep.mubr.msk.f32.mxu0 %vm380_vm1, %v458_v52 }
 0x4a4   :  { %v1412_v56 = vpop.eup %1411  ;;  %1298 = vmatmul.mubr.msk.f32.vlgmr.msra.gmra.mxu0 %vm380_vm1, %v460_v53  ;;  %v948_v53 = vsub.s32 4, %v1524_v25 }
 0x4a5   :  { %1301 = vmatpush3.msra.mxu0 %v563_v37  ;;  %1304 = vmatprep.mubr.msk.f32.mxu0 %vm380_vm1, %v454_v55  ;;  %v1414_v58 = vpop.eup %1413  ;;  %v462_v59 = vmul.f32 %v1412_v56, %v1398_v22 }
 0x4a6   :  { %1302 = vmatprep.subr.mxu0 %v561_v39  ;;  %v464_v61 = vmul.f32 %v1414_v58, %v1681_v20  ;;  %v949_v55 = vrot.slane %v1530_v27, %v948_v53  ;;  %v955_v58 = vrot.slane %v1530_v27, %v954_v54 }
 0x4a7   :  { %1303 = vmatpush3.msra.mxu0 %v561_v39 }
 0x4a8   :  { %v1416_v60 = vpop.eup %1415  ;;  %1307 = vmatprep.subr.mxu0 %v652_v38  ;;  %1305 = vmatmul.mubr.msk.f32.vlgmr.msra.gmra.mxu0 %vm380_vm1, %v456_v57 }
 0x4a9   :  { %1308 = vmatpush3.msra.mxu0 %v652_v38  ;;  %1311 = vmatprep.mubr.msk.f32.mxu0 %vm380_vm1, %v462_v59  ;;  %v1418_v62 = vpop.eup %1417  ;;  %v466_v2 = vmul.f32 %v1416_v60, %v1689_v28 }
 0x4aa   :  { %1309 = vmatprep.subr.mxu0 %v650_v41  ;;  %v468_v4 = vmul.f32 %v1418_v62, %v1686_v24  ;;  %v836_v24 = vrot.slane %v1530_v27, %v835_v23 }
 0x4ab   :  { %1310 = vmatpush3.msra.mxu0 %v650_v41 }
 0x4ac   :  { %1314 = vmatprep.subr.mxu0 %v743_v63  ;;  %1312 = vmatmul.mubr.msk.f32.vlgmr.msra.gmra.mxu0 %vm380_vm1, %v464_v61 }
 0x4ad   :  { %1315 = vmatpush3.msra.mxu0 %v743_v63  ;;  %1318 = vmatprep.mubr.msk.f32.mxu0 %vm380_vm1, %v466_v2 }
 0x4ae   :  { %1316 = vmatprep.subr.mxu0 %v741_v3 }
 0x4af   :  { %1317 = vmatpush3.msra.mxu0 %v741_v3  ;;  %v1080_v3 = vld [vmem:[%s1822_s4 + $0x78] sm:$0xff] }
 0x4b0   :  { %1319 = vmatmul.mubr.msk.f32.vlgmr.msra.gmra.mxu0 %vm380_vm1, %v468_v4  ;;  %1321 = vmatprep.subr.mxu0 %v832_v5  ;;  %v1079_v4 = vld [vmem:[%s1822_s4 + $0x70] sm:$0xff] }
 0x4b1   :  { %1322 = vmatpush3.msra.mxu0 %v832_v5  ;;  %1343 = vmatprep.subr.mxu1 %v1080_v3  ;;  %v1078_v5 = vld [vmem:[%s1822_s4 + $0x68] sm:$0xff] }
 0x4b2   :  { %1323 = vmatprep.subr.mxu0 %v831_v6  ;;  %1344 = vmatpush3.msra.mxu1 %v1080_v3 }
 0x4b3   :  { %1324 = vmatpush3.msra.mxu0 %v831_v6  ;;  %1345 = vmatprep.subr.mxu1 %v1079_v4  ;;  %v1077_v6 = vld [vmem:[%s1822_s4 + $0x60] sm:$0xff] }
 0x4b4   :  { %1325 = vmatprep.subr.mxu0 %v830_v7  ;;  %1346 = vmatpush3.msra.mxu1 %v1079_v4 }
 0x4b5   :  { %1326 = vmatpush3.msra.mxu0 %v830_v7  ;;  %1347 = vmatprep.subr.mxu1 %v1078_v5  ;;  %v1076_v7 = vld [vmem:[%s1822_s4 + $0x58] sm:$0xff] }
 0x4b6   :  { %1327 = vmatprep.subr.mxu0 %v829_v8  ;;  %1348 = vmatpush3.msra.mxu1 %v1078_v5 }
 0x4b7   :  { %1328 = vmatpush3.msra.mxu0 %v829_v8  ;;  %1349 = vmatprep.subr.mxu1 %v1077_v6  ;;  %v1075_v8 = vld [vmem:[%s1822_s4 + $0x50] sm:$0xff] }
 0x4b8   :  { %1332 = vmatprep.subr.mxu0 %v961_v43  ;;  %1350 = vmatpush3.msra.mxu1 %v1077_v6 }
 0x4b9   :  { %1351 = vmatprep.subr.mxu1 %v1076_v7 }
 0x4ba   :  { %1352 = vmatpush3.msra.mxu1 %v1076_v7 }
 0x4bb   :  { %1353 = vmatprep.subr.mxu1 %v1075_v8 }
 0x4bc   :  { %1354 = vmatpush3.msra.mxu1 %v1075_v8 }
 0x564   :  { %v1299_v9 = vpop.f32.mrf.mxu0 }
 0x566   :  { %v549_v10 = vpop.f32.mrf.mxu0 }
 0x568   :  { %v1306_v11 = vpop.f32.mrf.mxu0 }
 0x569   :  { %v644_v16 = vadd.f32 %v1306_v11, %v1299_v9  ;;  %v1074_v9 = vld [vmem:[%s1822_s4 + $0x48] sm:$0xff]  ;;  %v1072_v11 = vld [vmem:[%s1822_s4 + $0x38] sm:$0xff] }
 0x56a   :  { %v638_v12 = vpop.f32.mrf.mxu0  ;;  %1355 = vmatprep.subr.mxu1 %v1074_v9 }
 0x56b   :  { %v639_v15 = vadd.f32 %v638_v12, %v549_v10  ;;  %v1073_v10 = vld [vmem:[%s1822_s4 + $0x40] sm:$0xff]  ;;  %1356 = vmatpush3.msra.mxu1 %v1074_v9  ;;  %v1071_v12 = vld [vmem:[%s1822_s4 + $0x30] sm:$0xff] }
 0x56c   :  { %v1313_v13 = vpop.f32.mrf.mxu0  ;;  %1357 = vmatprep.subr.mxu1 %v1073_v10 }
 0x56d   :  { %v737_v19 = vadd.f32 %v1313_v13, %v644_v16  ;;  %1358 = vmatpush3.msra.mxu1 %v1073_v10  ;;  %v1070_v13 = vld [vmem:[%s1822_s4 + $0x28] sm:$0xff]  ;;  %v1067_v16 = vld [vmem:[%s1822_s4 + $0x10] sm:$0xff] }
 0x56e   :  { %v727_v14 = vpop.f32.mrf.mxu0  ;;  %1359 = vmatprep.subr.mxu1 %v1072_v11 }
 0x56f   :  { %v736_v18 = vadd.f32 %v727_v14, %v639_v15  ;;  %1360 = vmatpush3.msra.mxu1 %v1072_v11  ;;  %v1069_v14 = vld [vmem:[%s1822_s4 + $0x20] sm:$0xff]  ;;  %v1068_v15 = vld [vmem:[%s1822_s4 + $0x18] sm:$0xff] }
 0x570   :  { %v1320_v17 = vpop.f32.mrf.mxu0  ;;  %1361 = vmatprep.subr.mxu1 %v1071_v12 }
 0x571   :  { %v828_v22 = vadd.f32 %v1320_v17, %v737_v19  ;;  %1362 = vmatpush3.msra.mxu1 %v1071_v12  ;;  %v1066_v17 = vld [vmem:[%s1822_s4 + $0x8] sm:$0xff]  ;;  %v964_v19 = vsub.s32 6, %v1524_v25 }
 0x572   :  { %v818_v20 = vpop.f32.mrf.mxu0  ;;  %1363 = vmatprep.subr.mxu1 %v1070_v13 }
 0x573   :  { %v827_v21 = vadd.f32 %v818_v20, %v736_v18  ;;  %1364 = vmatpush3.msra.mxu1 %v1070_v13  ;;  %v1065_v18 = vld [vmem:[%s1822_s4] sm:$0xff]  ;;  %v965_v20 = vrot.slane %v1530_v27, %v964_v19  ;;  %s1451_s4 = smov [#allocation2]  }
 0x574   :  { %1365 = vmatprep.subr.mxu1 %v1069_v14  ;;  %s1169_s20 = sshll.u32 %s1451_s4, 4  ;;  %s1170_s20 = int_to_ptr.vmem [resolvable:$true] %s1169_s20 }
 0x575   :  { %1329 = vmatprep.mubr.msk.f32.mxu0 %vm38_vm0, %v827_v21  ;;  %1366 = vmatpush3.msra.mxu1 %v1069_v14  ;;  %s1427_s21 = scalar_lea.vmem %s1170_s20, 256  ;;  %p1432_p1 = scmp.lt.s32.totalorder %s1170_s20, %s1170_s20 }
 0x576   :  { %1330 = vmatmul.mubr.msk.f32.vlgmr.msra.gmra.mxu0 %vm38_vm0, %v828_v22  ;;  %1367 = vmatprep.subr.mxu1 %v1068_v15  ;;  %p1428_p0 = scmp.ne.s32.totalorder %s1170_s20, %s1427_s21  ;;  %p1433_p2 = scmp.lt.s32.totalorder %s1427_s21, %s1427_s21 }
 0x577   :  { %1333 = vmatpush3.msra.mxu0 %v961_v43  ;;  %1368 = vmatpush3.msra.mxu1 %v1068_v15 }
 0x578   :  { %1334 = vmatprep.subr.mxu0 %v960_v45  ;;  %1369 = vmatprep.subr.mxu1 %v1067_v16  ;;  %p1434_p3 = por %p1433_p2, %p1432_p1 }
 0x579   :  { %1335 = vmatpush3.msra.mxu0 %v960_v45  ;;  %1370 = vmatpush3.msra.mxu1 %v1067_v16 }
 0x57a   :  { %1336 = vmatprep.subr.mxu0 %v959_v42  ;;  %1371 = vmatprep.subr.mxu1 %v1066_v17  ;;  %p1435_p4 = pnand %p1434_p3, %p1428_p0 }
 0x57b   :  { %1337 = vmatpush3.msra.mxu0 %v959_v42  ;;  %1372 = vmatpush3.msra.mxu1 %v1066_v17  ;;  %v1083_v42 = vsub.s32 7, %v1524_v25 }
 0x57c   :  { %1338 = vmatprep.subr.mxu0 %v958_v46  ;;  %1373 = vmatprep.subr.mxu1 %v1065_v18 }
 0x57d   :  { %1339 = vmatpush3.msra.mxu0 %v958_v46  ;;  %1374 = vmatpush3.msra.mxu1 %v1065_v18  ;;  %v1084_v46 = vrot.slane %v1530_v27, %v1083_v42 }
 0x636   :  { %v1331_v26 = vpop.f32.mrf.mxu0 }
 0x637   :  { %v915_v28 = vadd.f32 %v1331_v26, %v836_v24 }
 0x638   :  { %v909_v29 = vpop.f32.mrf.mxu0 }
 0x639   :  { %v1728_v30 = vadd.f32 %v915_v28, %v1502_v1  ;;  %v910_v31 = vadd.f32 %v909_v29, %v836_v24 }
 0x63b   :  { %v1731_v32 = vadd.f32 %v910_v31, %v1497_v0  ;;  %v923_v33 = vsel %vm38_vm0, %v1728_v30, 0.0 }
 0x63c   :  { %924 = vadd.xlane.f32.xlu1 %v923_v33 }
 0x63d   :  { %v920_v34 = vsel %vm38_vm0, %v1731_v32, 0.0 }
 0x63e   :  { %921 = vadd.xlane.f32.xlu0 %v920_v34 }
 0x6c5   :  { %v925_v35 = vpop.xlane.xlu1 %924 }
 0x6c6   :  { %v927_v36 = vmul.f32 0.03125, %v925_v35 }
 0x6c7   :  { %v922_v37 = vpop.xlane.xlu0 %921 }
 0x6c8   :  { %v926_v38 = vmul.f32 0.03125, %v922_v37  ;;  %v929_v39 = vsub.f32 %v1728_v30, %v927_v36 }
 0x6ca   :  { %v928_v1 = vsub.f32 %v1731_v32, %v926_v38  ;;  %v931_v41 = vmul.f32 %v929_v39, %v929_v39 }
 0x6cc   :  { %v930_v40 = vmul.f32 %v928_v1, %v928_v1  ;;  %v935_v44 = vsel %vm38_vm0, %v931_v41, 0.0 }
 0x6ce   :  { %v932_v0 = vsel %vm38_vm0, %v930_v40, 0.0 }
 0x6cf   :  { %933 = vadd.xlane.f32.xlu0 %v932_v0 }
 0x6d3   :  { %936 = vadd.xlane.f32.xlu0 %v935_v44 }
 0x758   :  { %v934_v47 = vpop.xlane.xlu0 %933 }
 0x759   :  { %v938_v48 = vmul.f32 0.03125, %v934_v47 }
 0x75b   :  { %v940_v49 = vadd.f32 1e-05, %v938_v48 }
 0x75c   :  { %v937_v50 = vpop.xlane.xlu0 %936 }
 0x75d   :  { %1419 = vrsqrt.f32 %v940_v49  ;;  %v939_v51 = vmul.f32 0.03125, %v937_v50 }
 0x75f   :  { %v941_v52 = vadd.f32 1e-05, %v939_v51 }
 0x761   :  { %1421 = vrsqrt.f32 %v941_v52 }
 0x76a   :  { %v1420_v56 = vpop.eup %1419 }
 0x76b   :  { %v944_v57 = vmul.f32 %v1420_v56, %v928_v1 }
 0x76d   :  { %v950_v59 = vmul.f32 %v949_v55, %v944_v57 }
 0x76e   :  { %v1422_v60 = vpop.eup %1421 }
 0x76f   :  { %v945_v61 = vmul.f32 %v1422_v60, %v929_v39  ;;  %v956_v62 = vadd.f32 %v955_v58, %v950_v59 }
 0x771   :  { %v951_v63 = vmul.f32 %v949_v55, %v945_v61  ;;  %1340 = vmatprep.mubr.msk.f32.mxu0 %vm38_vm0, %v956_v62 }
 0x773   :  { %v957_v2 = vadd.f32 %v955_v58, %v951_v63 }
 0x775   :  { %1341 = vmatmul.mubr.msk.f32.vlgmr.msra.gmra.mxu0 %vm38_vm0, %v957_v2 }
 0x835   :  { %v1342_v21 = vpop.f32.mrf.mxu0 }
 0x836   :  { %v1044_v22 = vadd.f32 %v1342_v21, %v965_v20 }
 0x837   :  { %v1038_v23 = vpop.f32.mrf.mxu0 }
 0x838   :  { %v1050_v24 = vmul.f32 0.044715, %v1044_v22  ;;  %v1039_v26 = vadd.f32 %v1038_v23, %v965_v20  ;;  %v1048_v44 = vmul.f32 0.5, %v1044_v22 }
 0x83a   :  { %v1052_v28 = vmul.f32 %v1050_v24, %v1044_v22  ;;  %v1049_v29 = vmul.f32 0.044715, %v1039_v26  ;;  %v1047_v0 = vmul.f32 0.5, %v1039_v26 }
 0x83c   :  { %v1054_v31 = vmul.f32 %v1052_v28, %v1044_v22  ;;  %v1051_v33 = vmul.f32 %v1049_v29, %v1039_v26 }
 0x83e   :  { %v1056_v34 = vadd.f32 %v1054_v31, %v1044_v22  ;;  %v1053_v35 = vmul.f32 %v1051_v33, %v1039_v26 }
 0x840   :  { %v1058_v36 = vmul.f32 0.7978846, %v1056_v34  ;;  %v1055_v37 = vadd.f32 %v1053_v35, %v1039_v26 }
 0x842   :  { %1423 = vtanh.f32 %v1058_v36  ;;  %v1057_v38 = vmul.f32 0.7978846, %v1055_v37 }
 0x844   :  { %1425 = vtanh.f32 %v1057_v38 }
 0x84f   :  { %v1424_v39 = vpop.eup %1423 }
 0x850   :  { %v1062_v40 = vadd.f32 1.0, %v1424_v39 }
 0x851   :  { %v1426_v1 = vpop.eup %1425 }
 0x852   :  { %v1061_v41 = vadd.f32 1.0, %v1426_v1  ;;  %v1064_v45 = vmul.f32 %v1062_v40, %v1048_v44 }
 0x854   :  { %v1063_v43 = vmul.f32 %v1061_v41, %v1047_v0 }
 0x856   :  { %1375 = vmatprep.mubr.f32.mxu1 %v1063_v43 }
 0x857   :  { %1376 = vmatmul.mubr.f32.vlgmr.msra.gmra.mxu1 %v1064_v45 }
 0x917   :  { %v1377_v47 = vpop.f32.mrf.mxu1 }
 0x918   :  { %v1157_v48 = vadd.f32 %v1377_v47, %v1084_v46 }
 0x919   :  { %v1151_v49 = vpop.f32.mrf.mxu1 }
 0x91a   :  { %v1161_v50 = vadd.f32 %v1157_v48, %v1728_v30  ;;  %v1152_v51 = vadd.f32 %v1151_v49, %v1084_v46 }
 0x91c   :  { %1163 = vst.msk [vmem:[#allocation2 + $0x8] sm:$0xff] %vm38_vm0, %v1161_v50  ;;  %v1160_v52 = vadd.f32 %v1152_v51, %v1731_v32 }
 0x91e   :  { %1162 = vst.msk [vmem:[#allocation2] sm:$0xff] %vm38_vm0, %v1160_v52 }
 0x91f   :  { %1438 = shalt.err (!%p1435_p4)
}
 0x920   :  { %s1452_s22 = smov 128   ;;  %s1453_s23 = smov 8  }
 0x921   :  { %1175 = dma.vmem_to_hbm [thread:$0]  %s1170_s20, 256, %s1825_s7, [#allocation3], %s1452_s22, %s1452_s22, %s1453_s23  }
 0x922   :  { %1447 = dma.done.wait [#allocation3], 256  }
 0x923   :  { %1448 = vsyncadd [#allocation3], 4294967040 }
 0x924   :  { %1179 = vsyncpa [#allocation3], 1 }

</bundles_post_ra>
